<compile_context>
chip_gen: v5e
topology: v5e:2x2
jax: 0.10.0
libtpu: 0.0.40
codegen_flags: <defaults>
</compile_context>

<pallas_src>
import functools

import jax
import jax.numpy as jnp
from jax import lax
from jax.experimental import pallas as pl
from jax.experimental.pallas import tpu as pltpu

_LANES = 128
_SUBLANES = 8
_MAX_TILE_ROWS = 4096   # (4096, 128) f32 block = 2 MiB; 2 inputs x 2 buffers = 8 MiB VMEM
_NUM_SPLITS = 2         # leading 'parallel' axis: both TCs on v7x, no-op on v5e/v6e


def _round_up(x, m):
    return ((x + m - 1) // m) * m


def _sq_diff_sum_kernel(sr_ref, hr_ref, out_ref, *,
                        tile_rows, rows, tiles_per_split, need_mask):
    c = pl.program_id(0)   # core split     ("parallel")
    s = pl.program_id(1)   # reduction step ("arbitrary")

    @pl.when(s == 0)
    def _():
        out_ref[...] = jnp.zeros_like(out_ref)

    d = sr_ref[...].astype(jnp.float32) - hr_ref[...].astype(jnp.float32)
    dd = d * d

    if need_mask:
        # Zero rows past the real data (OOB-block garbage, or the duplicated
        # clamped tile on the overshooting split).  `rem` is a scalar, so the
        # per-element mask cost is one compare + one select on the VPU, which is
        # free filler under a memory-bound kernel.
        t = c * tiles_per_split + s
        rem = rows - t * tile_rows                         # scalar ALU
        local_row = lax.broadcasted_iota(jnp.int32, (tile_rows, _LANES), 0)
        dd = jnp.where(local_row < rem, dd, 0.0)

    # Vreg-shaped partial sum: leading-axis reduce is pure VPU adds.  The one
    # cross-lane/sublane reduce to a scalar is deferred to the wrapper.
    out_ref[...] += dd.reshape(tile_rows // _SUBLANES, _SUBLANES, _LANES).sum(axis=0)


def l2_loss(sr, hr, coef):
    """coef * mean((sr - hr)^2), matching F.mse_loss(sr, hr) * coef."""
    assert sr.shape == hr.shape, "sr and hr must have the same shape"
    total_n = sr.size
    assert total_n > 0

    # Glue: flatten to a lane-dense (rows, 128) slab in the *native* dtype
    # (no wrapper upcast -> no extra HBM traffic for bf16 inputs).
    sr_f = sr.reshape(-1)
    hr_f = hr.reshape(-1)
    pad = (-total_n) % _LANES
    if pad:
        # TODO(synk): tail not a multiple of 128 lanes; tiny zero pad (a copy of
        # the flattened array, only hit for odd sizes).  Zeros contribute 0 to
        # the sum; the mean divides by the true N.
        sr_f = jnp.pad(sr_f, (0, pad))
        hr_f = jnp.pad(hr_f, (0, pad))
    rows = sr_f.size // _LANES
    sr2 = sr_f.reshape(rows, _LANES)
    hr2 = hr_f.reshape(rows, _LANES)

    tile_rows = min(_MAX_TILE_ROWS, _round_up(rows, _SUBLANES))
    num_tiles = pl.cdiv(rows, tile_rows)
    num_splits = min(_NUM_SPLITS, num_tiles)
    tiles_per_split = pl.cdiv(num_tiles, num_splits)
    max_tile = num_tiles - 1

    if num_splits * tiles_per_split == num_tiles:
        def in_map(c, s):
            return (c * tiles_per_split + s, 0)
    else:
        # Odd tile count split across cores: clamp the block index so the DMA
        # never starts past the array; the row mask zeroes the duplicate tile.
        def in_map(c, s):
            return (jnp.minimum(c * tiles_per_split + s, max_tile), 0)

    need_mask = (num_splits * tiles_per_split * tile_rows) != rows

    kernel = functools.partial(
        _sq_diff_sum_kernel,
        tile_rows=tile_rows,
        rows=rows,
        tiles_per_split=tiles_per_split,
        need_mask=need_mask,
    )

    partials = pl.pallas_call(
        kernel,
        out_shape=jax.ShapeDtypeStruct((num_splits, _SUBLANES, _LANES), jnp.float32),
        grid_spec=pltpu.PrefetchScalarGridSpec(
            num_scalar_prefetch=0,
            grid=(num_splits, tiles_per_split),
            in_specs=[
                pl.BlockSpec((tile_rows, _LANES), in_map),
                pl.BlockSpec((tile_rows, _LANES), in_map),
            ],
            # Output block index is constant along the reduction axis -> it stays
            # resident in VMEM and acts as the per-split accumulator.
            out_specs=pl.BlockSpec((None, _SUBLANES, _LANES),
                                   lambda c, s: (c, 0, 0)),
        ),
        compiler_params=pltpu.CompilerParams(
            dimension_semantics=("parallel", "arbitrary"),
            vmem_limit_bytes=32 * 1024 * 1024),
    )(sr2, hr2)

    # Final cross-lane/sublane reduce + scaling (tiny; done once in plain JAX).
    sq_sum = jnp.sum(partials, dtype=jnp.float32)
    return jnp.float32(coef) * sq_sum / jnp.float32(total_n)


if __name__ == "__main__":
    # TODO(synk): loss_logger.cache_in is host-side logging, not part of the
    # numeric forward pass; it has no kernel equivalent and is omitted.
    key = jax.random.PRNGKey(0)
    k_sr, k_hr, k_sr2, k_hr2 = jax.random.split(key, 4)

    B, C, H, W = 2, 4, 16, 16  # NCHW, matching PyTorch convention
    sr = jax.random.normal(k_sr, (B, C, H, W), dtype=jnp.float32)
    hr = jax.random.normal(k_hr, (B, C, H, W), dtype=jnp.float32)
    coef = 0.5

    loss = jax.block_until_ready(l2_loss(sr, hr, coef))
    ref = coef * jnp.mean((sr - hr) ** 2)
    assert jnp.allclose(loss, ref, rtol=1e-5, atol=1e-6), (loss, ref)

    # Ragged-size check exercising the lane pad + in-kernel tail-mask path.
    sr_odd = jax.random.normal(k_sr2, (3, 5, 7, 11), dtype=jnp.float32)
    hr_odd = jax.random.normal(k_hr2, (3, 5, 7, 11), dtype=jnp.float32)
    loss_odd = jax.block_until_ready(l2_loss(sr_odd, hr_odd, 1.25))
    ref_odd = 1.25 * jnp.mean((sr_odd - hr_odd) ** 2)
    assert jnp.allclose(loss_odd, ref_odd, rtol=1e-5, atol=1e-6), (loss_odd, ref_odd)

    print("KERNEL_OK")
</pallas_src>

<mosaic_0001>
module attributes {stable_mosaic.version = 11 : i64} {
  func.func @_sq_diff_sum_kernel(%arg0: i32, %arg1: i32, %arg2: memref<16x128xf32, #tpu.memory_space<vmem>>, %arg3: memref<16x128xf32, #tpu.memory_space<vmem>>, %arg4: memref<1x8x128xf32, #tpu.memory_space<vmem>>) attributes {dimension_semantics = [#tpu.dimension_semantics<parallel>, #tpu.dimension_semantics<arbitrary>], iteration_bounds = array<i64: 1, 1>, scalar_prefetch = 0 : i64, scratch_operands = 0 : i64, tpu.core_type = #tpu.core_type<tc>, window_params = [{transform_indices = @transform_0, window_bounds = array<i64: 16, 128>}, {transform_indices = @transform_1, window_bounds = array<i64: 16, 128>}, {transform_indices = @transform_2, window_bounds = array<i64: 1, 8, 128>}]} {
    %c0_i32 = arith.constant 0 : i32
    %0 = arith.cmpi eq, %arg1, %c0_i32 : i32
    %1 = arith.extui %0 : i1 to i32
    %c0_i32_0 = arith.constant 0 : i32
    %2 = arith.cmpi ne, %1, %c0_i32_0 : i32
    scf.if %2 {
      %cst_10 = arith.constant 0.000000e+00 : f32
      %15 = vector.broadcast %cst_10 : f32 to vector<8x128xf32>
      %c0_11 = arith.constant 0 : index
      %c0_12 = arith.constant 0 : index
      %c0_13 = arith.constant 0 : index
      %16 = vector.load %arg4[%c0_11, %c0_12, %c0_13] : memref<1x8x128xf32, #tpu.memory_space<vmem>>, vector<1x8x128xf32>
      %17 = vector.shape_cast %16 : vector<1x8x128xf32> to vector<8x128xf32>
      %18 = vector.shape_cast %15 : vector<8x128xf32> to vector<1x8x128xf32>
      tpu.vector_store %arg4[%c0_11, %c0_12, %c0_13], %18 {strides = array<i32>} : memref<1x8x128xf32, #tpu.memory_space<vmem>>, vector<1x8x128xf32>,
    } else {
    }
    %c0 = arith.constant 0 : index
    %c0_1 = arith.constant 0 : index
    %3 = vector.load %arg2[%c0, %c0_1] : memref<16x128xf32, #tpu.memory_space<vmem>>, vector<16x128xf32>
    %c0_2 = arith.constant 0 : index
    %c0_3 = arith.constant 0 : index
    %4 = vector.load %arg3[%c0_2, %c0_3] : memref<16x128xf32, #tpu.memory_space<vmem>>, vector<16x128xf32>
    %5 = arith.subf %3, %4 : vector<16x128xf32>
    %6 = arith.mulf %5, %5 : vector<16x128xf32>
    %c0_4 = arith.constant 0 : index
    %c0_5 = arith.constant 0 : index
    %c0_6 = arith.constant 0 : index
    %7 = vector.load %arg4[%c0_4, %c0_5, %c0_6] : memref<1x8x128xf32, #tpu.memory_space<vmem>>, vector<1x8x128xf32>
    %8 = vector.shape_cast %7 : vector<1x8x128xf32> to vector<8x128xf32>
    %9 = vector.shape_cast %6 : vector<16x128xf32> to vector<2x8x128xf32>
    %cst = arith.constant dense<0.000000e+00> : vector<8x128xf32>
    %10 = vector.multi_reduction <add>, %9, %cst [0] : vector<2x8x128xf32> to vector<8x128xf32>
    %11 = arith.addf %8, %10 : vector<8x128xf32>
    %c0_7 = arith.constant 0 : index
    %c0_8 = arith.constant 0 : index
    %c0_9 = arith.constant 0 : index
    %12 = vector.load %arg4[%c0_7, %c0_8, %c0_9] : memref<1x8x128xf32, #tpu.memory_space<vmem>>, vector<1x8x128xf32>
    %13 = vector.shape_cast %12 : vector<1x8x128xf32> to vector<8x128xf32>
    %14 = vector.shape_cast %11 : vector<8x128xf32> to vector<1x8x128xf32>
    tpu.vector_store %arg4[%c0_7, %c0_8, %c0_9], %14 {strides = array<i32>} : memref<1x8x128xf32, #tpu.memory_space<vmem>>, vector<1x8x128xf32>,
    return
  }
  func.func @transform_0(%arg0: i32, %arg1: i32) -> (i32, i32) {
    %c1_i32 = arith.constant 1 : i32
    %0 = arith.muli %arg0, %c1_i32 : i32
    %1 = arith.addi %0, %arg1 : i32
    %c0_i32 = arith.constant 0 : i32
    %c0_i32_0 = arith.constant 0 : i32
    return %1, %c0_i32 : i32, i32
  }
  func.func @transform_1(%arg0: i32, %arg1: i32) -> (i32, i32) {
    %c1_i32 = arith.constant 1 : i32
    %0 = arith.muli %arg0, %c1_i32 : i32
    %1 = arith.addi %0, %arg1 : i32
    %c0_i32 = arith.constant 0 : i32
    %c0_i32_0 = arith.constant 0 : i32
    return %1, %c0_i32 : i32, i32
  }
  func.func @transform_2(%arg0: i32, %arg1: i32) -> (i32, i32, i32) {
    %c0_i32 = arith.constant 0 : i32
    %c0_i32_0 = arith.constant 0 : i32
    %c0_i32_1 = arith.constant 0 : i32
    return %arg0, %c0_i32, %c0_i32_0 : i32, i32, i32
  }
}

</mosaic_0001>

<bundles_post_ra>
// kernel: tpu_custom_call.1
= control target key start
LH: loop header
LB: loop body
LE: loop exit
PB: predicated region body
PF: predicated region fallthrough
CT: control target
= control target key end

     0   :  { %7 = vsyncpa [#allocation3], 0  ;;  %s204_s0 = inlined_call_operand.hbm [shape: f32[16,128], index: 0, kind: input, shape index: {}]   ;;  %s205_s1 = inlined_call_operand.hbm [shape: f32[16,128], index: 1, kind: input, shape index: {}]   ;;  %s206_s2 = inlined_call_operand.hbm [shape: f32[1,8,128], index: 2, kind: output, shape index: {}]  }
   0x1   :  { %8 = vsyncpa [#allocation6], 0 }
   0x2   :  { %9 = vsyncpa [#allocation4], 0  ;;  %s18_s11 = sshll.u32 %s204_s0, 4  ;;  %s175_s12 = smov [#allocation2]   ;;  %s19_s11 = int_to_ptr.hbm [resolvable:$true] %s18_s11 }
   0x3   :  { %s20_s13 = sshll.u32 %s175_s12, 4  ;;  %s35_s16 = sshll.u32 %s205_s1, 4  ;;  %s21_s13 = int_to_ptr.vmem [resolvable:$true] %s20_s13  ;;  %s36_s16 = int_to_ptr.hbm [resolvable:$true] %s35_s16 }
   0x4   :  { %s176_s17 = smov 128   ;;  %s177_s18 = smov 8  }
   0x5   :  { %26 = dma.hbm_to_vmem [thread:$0]  %s19_s11, 256, %s21_s13, [#allocation3], %s176_s17, %s176_s17, %s177_s18  }
   0x6   :  { %s178_s19 = smov [#allocation5]  }
   0x7   :  { %s37_s20 = sshll.u32 %s178_s19, 4  ;;  %s38_s20 = int_to_ptr.vmem [resolvable:$true] %s37_s20 }
   0x8   :  { %43 = dma.hbm_to_vmem [thread:$0]  %s36_s16, 256, %s38_s20, [#allocation6], %s176_s17, %s176_s17, %s177_s18  }
   0x9   :  { %169 = dma.done.wait [#allocation3], 256  }
   0xa   :  { %170 = vsyncadd [#allocation3], 4294967040 }
   0xb   :  { %171 = dma.done.wait [#allocation6], 256  }
   0xc   :  { %172 = vsyncadd [#allocation6], 4294967040  ;;  %v61_v0 = vld [vmem:[#allocation2] sm:$0xff]  ;;  %v62_v1 = vld [vmem:[#allocation2 + $0x8] sm:$0xff]  ;;  %s179_s0 = smov [#allocation7]   ;;  %s80_s23 = sshll.u32 %s206_s2, 4  ;;  %s81_s23 = int_to_ptr.hbm [resolvable:$true] %s80_s23 }
   0xd   :  { %v63_v2 = vld [vmem:[#allocation5] sm:$0xff]  ;;  %v64_v3 = vld [vmem:[#allocation5 + $0x8] sm:$0xff]  ;;  %s78_s1 = sshll.u32 %s179_s0, 4  ;;  %s79_s1 = int_to_ptr.vmem [resolvable:$true] %s78_s1 }
   0xe   :  { %v65_v4 = vsub.f32 %v61_v0, %v63_v2  ;;  %v66_v5 = vsub.f32 %v62_v1, %v64_v3 }
  0x10   :  { %v67_v6 = vmul.f32 %v65_v4, %v65_v4  ;;  %v68_v7 = vmul.f32 %v66_v5, %v66_v5 }
  0x12   :  { %v70_v8 = vadd.f32 %v68_v7, %v67_v6 }
  0x14   :  { %72 = vst [vmem:[#allocation7] sm:$0xff] %v70_v8 }
  0x15   :  { %83 = dma.vmem_to_hbm [thread:$0]  %s79_s1, 128, %s81_s23, [#allocation4]  }
  0x16   :  { %173 = dma.done.wait [#allocation4], 128  }
  0x17   :  { %174 = vsyncadd [#allocation4], 4294967168 }
  0x18   :  { %88 = vsyncpa [#allocation3], 1 }
  0x19   :  { %89 = vsyncpa [#allocation6], 1 }
  0x1a   :  { %90 = vsyncpa [#allocation4], 1 }

</bundles_post_ra>
